<compile_context>
chip_gen: v7x
topology: tpu7x:2x2x1
jax: 0.10.0
libtpu: 0.0.40
codegen_flags: <defaults>
</compile_context>

<pallas_src>
import functools

import jax
import jax.numpy as jnp
from jax.experimental import pallas as pl
from jax.experimental.pallas import tpu as pltpu

IN_CH = 16   # ConvTranspose2d in_channels  (== size of x's dim 2)
OUT_CH = 16  # ConvTranspose2d out_channels


def _mix_bias_sigmoid_kernel(x_ref, w_ref, b_ref, o_ref, *, num_sub, rows):
    # x_ref: (BG*IN_CH, TW)        activation rows, W lane-dense
    # w_ref: (bg*OUT_CH, bg*IN_CH) block-diagonal channel mixer (resident)
    # b_ref: (bg*OUT_CH, 1)        bias column (resident)
    # o_ref: (BG*OUT_CH, TW)
    w = w_ref[...]
    b = b_ref[...]
    for s in range(num_sub):  # static, small trip count -> fully unrolled
        sl = pl.ds(s * rows, rows)  # static offsets, zero addressing cost
        acc = jnp.dot(w, x_ref[sl, :], preferred_element_type=jnp.float32)
        acc = acc + b
        # exp and approx-reciprocal both go to the EUP slot (separate VLIW slot
        # from the VPU), so the sigmoid epilogue hides under DMA/stores.
        o_ref[sl, :] = pl.reciprocal(1.0 + jnp.exp(-acc),
                                     approx=True).astype(o_ref.dtype)


def _largest_divisor_leq(n, cap):
    return max(d for d in range(1, min(cap, n) + 1) if n % d == 0)


def _choose_w_tile(w, itemsize, *, kron_rows=128, target_bytes=1 << 20):
    """Tile W (multiples of 128 lanes, dividing W) only when a single
    128-row x W sub-slab would exceed the block byte target."""
    max_tw = max(128, target_bytes // (kron_rows * itemsize))
    if w <= max_tw:
        return w
    best = None
    for tw in range(128, max_tw + 1, 128):
        if w % tw == 0:
            best = tw
    # TODO(synk): huge W with no multiple-of-128 divisor falls back to untiled.
    return best if best is not None else w


def _choose_groups(nc, tw, itemsize, *, kron_cap=8, target_bytes=1 << 20,
                   min_total_steps=4, w_tiles=1):
    """bg: groups fused in one block-diagonal MXU matmul (<=8 -> 128x128 kron).
       BG: groups streamed per grid step (multiple of bg, divides nc), sized to
       the ~1 MiB DMA sweet spot while keeping enough pipelined grid steps."""
    bg = _largest_divisor_leq(nc, kron_cap)
    group_bytes = IN_CH * tw * itemsize
    min_steps = max(1, -(-min_total_steps // w_tiles))        # ceil divide
    steps_at_min_bg = nc // bg
    effective_min = min(min_steps, steps_at_min_bg)           # can't exceed what exists
    best = bg
    best_even = None
    m = 1
    while bg * m <= nc:
        cand = bg * m
        if (nc % cand == 0
                and cand * group_bytes <= max(target_bytes, bg * group_bytes)):
            steps = nc // cand
            if steps >= effective_min:
                best = cand
                if (steps * w_tiles) % 2 == 0:   # even total steps: TC balance
                    best_even = cand
        m += 1
    # Mild preference for an even total step count (v7x 2-TC load balance), as
    # long as it costs at most a 2x smaller block.
    if best_even is not None and 2 * best_even >= best:
        best = best_even
    return bg, best


def model_forward(x, weight, bias, *, target_block_bytes=1 << 20,
                  min_total_steps=4):
    """x: (N, C, 16, W) float32; weight: (16, 16, 1, 1); bias: (16,)."""
    N, C, H, W = x.shape
    assert H == IN_CH, "dim 2 of x must equal ConvTranspose2d in_channels (16)"
    NC = N * C
    itemsize = x.dtype.itemsize

    tw = _choose_w_tile(W, itemsize, target_bytes=target_block_bytes)
    w_tiles = W // tw

    bg, BG = _choose_groups(NC, tw, itemsize, kron_cap=8,
                            target_bytes=target_block_bytes,
                            min_total_steps=min_total_steps, w_tiles=w_tiles)

    # Free, layout-preserving view: row (n*C + c)*16 + h  ->  x[n, c, h, :].
    x_rows = x.reshape(NC * IN_CH, W)

    # ConvTranspose2d weight layout (in_ch, out_ch, 1, 1): y_o = sum_i x_i W[i,o] + b_o.
    w_t = weight[:, :, 0, 0].T.astype(jnp.float32)             # (out, in)
    # Fixed small block-diagonal mixer (<=128x128), resident across the grid.
    # NOTE: mixes bg unrelated (n,c) groups in one MXU accumulation; fine for
    # finite inputs (0 * Inf would cross-contaminate groups).
    w_bd = jnp.kron(jnp.eye(bg, dtype=jnp.float32), w_t)       # (bg*out, bg*in)
    b_col = jnp.tile(bias.astype(jnp.float32), bg).reshape(bg * OUT_CH, 1)

    rows = bg * IN_CH            # rows per MXU sub-slab (<= 128)
    num_sub = BG // bg           # sub-slabs per streamed block
    blk_rows = BG * IN_CH        # streamed block rows (multiple of rows)

    kernel = functools.partial(_mix_bias_sigmoid_kernel,
                               num_sub=num_sub, rows=rows)

    grid = (NC // BG, w_tiles)

    out_rows = pl.pallas_call(
        kernel,
        out_shape=jax.ShapeDtypeStruct((NC * OUT_CH, W), x.dtype),
        grid_spec=pltpu.PrefetchScalarGridSpec(
            num_scalar_prefetch=0,
            grid=grid,
            in_specs=[
                pl.BlockSpec((blk_rows, tw), lambda i, j: (i, j)),   # activations
                pl.BlockSpec((rows, rows), lambda i, j: (0, 0)),     # resident weights
                pl.BlockSpec((rows, 1), lambda i, j: (0, 0)),        # resident bias
            ],
            out_specs=pl.BlockSpec((blk_rows, tw), lambda i, j: (i, j)),
        ),
        compiler_params=pltpu.CompilerParams(
            dimension_semantics=("parallel", "parallel"),
            vmem_limit_bytes=32 * 1024 * 1024,
        ),
    )(x_rows, w_bd, b_col)

    # Free view back; the mixed axis already sits at dim 2, so no transpose.
    return out_rows.reshape(N, C, OUT_CH, W)


if __name__ == "__main__":
    key = jax.random.PRNGKey(0)
    kx, kw, kb = jax.random.split(key, 3)

    # Small shape consistent with the module: dim 2 must equal 16 (the conv
    # channel dim after transpose); W chosen as a multiple of 128 (lane-dense).
    # NC = 64 exercises the multi-step grid (4 even steps) and the in-kernel
    # sub-slab loop (BG = 16 groups/step, 2 x 128-row matmuls per step).
    x = jax.random.normal(kx, (4, 16, 16, 128), dtype=jnp.float32)

    # Deterministic params (shapes from ConvTranspose2d(16, 16, (1, 1))).
    bound = 1.0 / (IN_CH ** 0.5)
    weight = jax.random.uniform(kw, (IN_CH, OUT_CH, 1, 1),
                                minval=-bound, maxval=bound, dtype=jnp.float32)
    bias = jax.random.uniform(kb, (OUT_CH,),
                              minval=-bound, maxval=bound, dtype=jnp.float32)

    out = model_forward(x, weight, bias)
    out = jax.block_until_ready(out)

    # Plain-JAX reference of the same semantics.
    ref = jax.nn.sigmoid(
        jnp.einsum('nchw,ho->ncow', x, weight[:, :, 0, 0])
        + bias[None, None, :, None])
    assert out.shape == ref.shape
    # Tolerance covers the EUP approximate reciprocal in the sigmoid epilogue
    # and the multi-pass-bf16 f32 MXU on v5e/v6e (both << 2e-3 on (0,1) outputs).
    assert jnp.allclose(out, ref, atol=2e-3, rtol=2e-3)

    print("KERNEL_OK")
</pallas_src>

<mosaic_0001>
module attributes {stable_mosaic.version = 11 : i64} {
  func.func @_mix_bias_sigmoid_kernel(%arg0: i32, %arg1: i32, %arg2: memref<256x128xf32, #tpu.memory_space<vmem>>, %arg3: memref<128x128xf32, #tpu.memory_space<vmem>>, %arg4: memref<128x1xf32, #tpu.memory_space<vmem>>, %arg5: memref<256x128xf32, #tpu.memory_space<vmem>>) attributes {dimension_semantics = [#tpu.dimension_semantics<parallel>, #tpu.dimension_semantics<parallel>], iteration_bounds = array<i64: 4, 1>, scalar_prefetch = 0 : i64, scratch_operands = 0 : i64, tpu.core_type = #tpu.core_type<tc>, window_params = [{transform_indices = @transform_0, window_bounds = array<i64: 256, 128>}, {pipeline_mode = #tpu.pipeline_mode<synchronous>, transform_indices = @transform_1, window_bounds = array<i64: 128, 128>}, {pipeline_mode = #tpu.pipeline_mode<synchronous>, transform_indices = @transform_2, window_bounds = array<i64: 128, 1>}, {transform_indices = @transform_3, window_bounds = array<i64: 256, 128>}]} {
    %c0 = arith.constant 0 : index
    %c0_0 = arith.constant 0 : index
    %0 = vector.load %arg3[%c0, %c0_0] : memref<128x128xf32, #tpu.memory_space<vmem>>, vector<128x128xf32>
    %c0_1 = arith.constant 0 : index
    %c0_2 = arith.constant 0 : index
    %1 = vector.load %arg4[%c0_1, %c0_2] : memref<128x1xf32, #tpu.memory_space<vmem>>, vector<128x1xf32>
    %c0_3 = arith.constant 0 : index
    %c0_4 = arith.constant 0 : index
    %2 = vector.load %arg2[%c0_3, %c0_4] : memref<256x128xf32, #tpu.memory_space<vmem>>, vector<128x128xf32>
    %cst = arith.constant dense<0.000000e+00> : vector<128x128xf32>
    %3 = tpu.matmul %0, %2, %cst {dimension_numbers = #tpu.dot_dimension_numbers<[1], [0], [0], [1], [0, 0, 1, 1], [], []>} : vector<128x128xf32>, vector<128x128xf32>, vector<128x128xf32> -> vector<128x128xf32>
    %4 = vector.broadcast %1 : vector<128x1xf32> to vector<128x128xf32>
    %5 = arith.addf %3, %4 : vector<128x128xf32>
    %cst_5 = arith.constant 0.000000e+00 : f32
    %6 = vector.broadcast %cst_5 : f32 to vector<128x128xf32>
    %7 = arith.subf %6, %5 : vector<128x128xf32>
    %8 = math.exp %7 : vector<128x128xf32>
    %cst_6 = arith.constant 1.000000e+00 : f32
    %9 = vector.broadcast %cst_6 : f32 to vector<128x128xf32>
    %10 = arith.addf %9, %8 : vector<128x128xf32>
    %11 = tpu.reciprocal %10 {approx = true} : vector<128x128xf32> -> vector<128x128xf32>
    %c0_7 = arith.constant 0 : index
    %c0_8 = arith.constant 0 : index
    %12 = vector.load %arg5[%c0_7, %c0_8] : memref<256x128xf32, #tpu.memory_space<vmem>>, vector<128x128xf32>
    tpu.vector_store %arg5[%c0_7, %c0_8], %11 {strides = array<i32>} : memref<256x128xf32, #tpu.memory_space<vmem>>, vector<128x128xf32>,
    %c128 = arith.constant 128 : index
    %c0_9 = arith.constant 0 : index
    %13 = vector.load %arg2[%c128, %c0_9] : memref<256x128xf32, #tpu.memory_space<vmem>>, vector<128x128xf32>
    %cst_10 = arith.constant dense<0.000000e+00> : vector<128x128xf32>
    %14 = tpu.matmul %0, %13, %cst_10 {dimension_numbers = #tpu.dot_dimension_numbers<[1], [0], [0], [1], [0, 0, 1, 1], [], []>} : vector<128x128xf32>, vector<128x128xf32>, vector<128x128xf32> -> vector<128x128xf32>
    %15 = vector.broadcast %1 : vector<128x1xf32> to vector<128x128xf32>
    %16 = arith.addf %14, %15 : vector<128x128xf32>
    %cst_11 = arith.constant 0.000000e+00 : f32
    %17 = vector.broadcast %cst_11 : f32 to vector<128x128xf32>
    %18 = arith.subf %17, %16 : vector<128x128xf32>
    %19 = math.exp %18 : vector<128x128xf32>
    %cst_12 = arith.constant 1.000000e+00 : f32
    %20 = vector.broadcast %cst_12 : f32 to vector<128x128xf32>
    %21 = arith.addf %20, %19 : vector<128x128xf32>
    %22 = tpu.reciprocal %21 {approx = true} : vector<128x128xf32> -> vector<128x128xf32>
    %c128_13 = arith.constant 128 : index
    %c0_14 = arith.constant 0 : index
    %23 = vector.load %arg5[%c128_13, %c0_14] : memref<256x128xf32, #tpu.memory_space<vmem>>, vector<128x128xf32>
    tpu.vector_store %arg5[%c128_13, %c0_14], %22 {strides = array<i32>} : memref<256x128xf32, #tpu.memory_space<vmem>>, vector<128x128xf32>,
    return
  }
  func.func @transform_0(%arg0: i32, %arg1: i32) -> (i32, i32) {
    %c0_i32 = arith.constant 0 : i32
    return %arg0, %arg1 : i32, i32
  }
  func.func @transform_1(%arg0: i32, %arg1: i32) -> (i32, i32) {
    %c0_i32 = arith.constant 0 : i32
    %c0_i32_0 = arith.constant 0 : i32
    %c0_i32_1 = arith.constant 0 : i32
    return %c0_i32, %c0_i32_0 : i32, i32
  }
  func.func @transform_2(%arg0: i32, %arg1: i32) -> (i32, i32) {
    %c0_i32 = arith.constant 0 : i32
    %c0_i32_0 = arith.constant 0 : i32
    %c0_i32_1 = arith.constant 0 : i32
    return %c0_i32, %c0_i32_0 : i32, i32
  }
  func.func @transform_3(%arg0: i32, %arg1: i32) -> (i32, i32) {
    %c0_i32 = arith.constant 0 : i32
    return %arg0, %arg1 : i32, i32
  }
}

</mosaic_0001>

<bundles_post_ra>
// kernel: tpu_custom_call.1
= control target key start
LH: loop header
LB: loop body
LE: loop exit
PB: predicated region body
PF: predicated region fallthrough
CT: control target
= control target key end

     0   :  { %8 = vsyncpa [#allocation3], 0  ;;  %s1889_s0 = inlined_call_operand.hbm [shape: f32[1024,128], index: 0, kind: input, shape index: {}]   ;;  %s1890_s1 = inlined_call_operand.vmem [shape: f32[128,128], index: 1, kind: input, shape index: {}]   ;;  %s1891_s2 = inlined_call_operand.vmem [shape: f32[128,1], index: 2, kind: input, shape index: {}]   ;;  %s1892_s3 = inlined_call_operand.hbm [shape: f32[1024,128], index: 3, kind: output, shape index: {}]  }
   0x1   :  { %10 = vsyncpa [#allocation3 + $0x1], 0 }
   0x2   :  { %11 = vsyncpa [#allocation4], 0 }
   0x3   :  { %13 = vsyncpa [#allocation4 + $0x1], 0  ;;  %s1529_s12 = smov 0   ;;  %s1531_s13 = smov 0  }
   0x4   :  { %s1533_s14 = smov 0   ;;  %s1535_s15 = smov 0  }
   0x5   :  { %s1537_s16 = smov 0   ;;  %s1539_s17 = smov 0  }
   0x6 LB: > { %s934_s18 = sadd.s32 4294967295, %s1500_s17   ;;  %s935_s19 = sadd.s32 4294967294, %s1500_s17   ;;  %s1500_s17 = sphi %s1539_s17, %s19_s17   ;;  %s1496_s16 = sphi %s1537_s16, %s1906_s16   ;;  %s1492_s15 = sphi %s1535_s15, %s1905_s15   ;;  %s1488_s14 = sphi %s1533_s14, %s1904_s14   ;;  %s1484_s13 = sphi %s1531_s13, %s1903_s13   ;;  %s1480_s12 = sphi %s1529_s12, %s1902_s12  }
   0x7   : > { %s31_s20 = sadd.s32 1, %s1496_s16  ;;  %s40_s21 = sadd.s32 1, %s1488_s14 }
   0x8   : > { %p33_p0 = scmp.ge.s32.totalorder %s31_s20, 4  ;;  %p47_p1 = scmp.ne.s32.totalorder %s1488_s14, %s1484_s13 }
   0x9   : > { %p48_p2 = scmp.eq.s32.totalorder %s1500_s17, 0  ;;  %p53_p3 = scmp.ne.s32.totalorder %s1484_s13, %s1480_s12 }
   0xa   : > { %s1908_s20 = smov (%p33_p0, %s31_s20), 0  ;;  %p54_p5 = scmp.eq.s32.totalorder %s934_s18, 0 }
   0xb   : > { %p1570_p4 = por %p48_p2, %p47_p1  ;;  %s35_s23 = ssub.s32 %s1496_s16, %s1908_s20 }
   0xc   : > { %p121_p6 = scmp.eq.s32.totalorder %s934_s18, 3  ;;  %p38_p7 = scmp.eq.s32.totalorder %s35_s23, 0 }
   0xd   : > { %p1576_p8 = por %p54_p5, %p53_p3  ;;  %p127_p10 = scmp.eq.s32.totalorder %s935_s19, 3 }
   0xe   : > { %p1580_p9 = por %p121_p6, %p47_p1  ;;  %p1203_p12 = scmp.lt.s32.totalorder %s1500_s17, 4 }
   0xf   : > { %s1585_s26 = scalar_select %p38_p7, %s1488_s14, %s40_s21  }
  0x10   : > { %s1896_s25 = scalar_select %p1580_p9, 1, 0 }
  0x11   : > { %p1587_p11 = por %p127_p10, %p53_p3  ;;  %s153_s28 = sand.u32 1, %s1488_s14  }
  0x12   : > { %s938_s29 = sshll.u32 %s153_s28, 8  ;;  %s949_s30 = sshll.u32 %s1496_s16, 12 }
  0x13   : > { %s1897_s27 = scalar_select %p1587_p11, 1, 0 }
  0x14   : > { %s1597_s6 = scalar_lea.hbm %s1889_s0, %s949_s30  ;;  %s157_s7 = scalar_lea.vmem [#allocation2], %s938_s29 }
  0x15   : > { %s165_s8 = sshll.u32 %s157_s7, 4  ;;  %p1603_p13 = pnand %p1203_p12, %p1570_p4  ;;  %s1599_s8 = int_to_ptr.vmem [resolvable:$true] %s165_s8 }
  0x16   : > { %s1608_s10 = scalar_lea.sflag [#allocation3], %s153_s28  ;;  %s1388_s11 = scalar_lea.hbm %s1597_s6, 4096 }
  0x17   : > { %p1389_p1 = scmp.ne.s32.totalorder %s1597_s6, %s1388_s11  ;;  %p1390_p2 = pneg %p1603_p13 }
  0x18   : > { %s1393_s21 = scalar_lea.hbm %s1889_s0, 16384  ;;  %p1394_p4 = scmp.lt.u32.totalorder %s1597_s6, %s1889_s0 }
  0x19   : > { %p1391_p3 = pnand %p1390_p2, %p1389_p1  ;;  %p1395_p6 = scmp.lt.u32.totalorder %s1393_s21, %s1388_s11 }
  0x1a   : > { %p1397_p10 = scmp.lt.u32.totalorder %s1388_s11, %s1597_s6 }
  0x1b   : > { %p1392_p5 = pneg %p1391_p3  ;;  %p1396_p7 = por %p1395_p6, %p1394_p4 }
  0x1d   : > { %p1398_p12 = por %p1397_p10, %p1396_p7 }
  0x1f   : > { %p1399_p0 = pnand %p1398_p12, %p1392_p5 }
  0x21   : > { %1402 = shalt.err (!%p1399_p0)
}
  0x22   : > { %s1403_s28 = scalar_lea.vmem %s1599_s8, 4096  ;;  %s1502_s29 = smov [#allocation2]  }
  0x23   : > { %p1404_p1 = scmp.ne.s32.totalorder %s1599_s8, %s1403_s28  ;;  %s1408_s30 = sshll.u32 %s1502_s29, 4  ;;  %s1409_s30 = int_to_ptr.vmem [resolvable:$false] %s1408_s30 }
  0x24   : > { %s1410_s4 = scalar_lea.vmem %s1409_s30, 8192  ;;  %p1411_p9 = scmp.lt.s32.totalorder %s1599_s8, %s1409_s30 }
  0x25   : > { %p1406_p3 = pnand %p1404_p1, %p1390_p2  ;;  %p1412_p4 = scmp.lt.s32.totalorder %s1410_s4, %s1403_s28 }
  0x27   : > { %p1407_p11 = pneg %p1406_p3  ;;  %p1413_p6 = por %p1412_p4, %p1411_p9 }
  0x29   : > { %p1414_p7 = pnand %p1413_p6, %p1407_p11 }
  0x2b   : > { %1417 = shalt.err (!%p1414_p7)
}
  0x2c   : > { %s1503_s5 = smov 128   ;;  %s1504_s7 = smov 8  }
  0x2d   : > { %1198 = dma.hbm_to_vmem [thread:$0]  (!%p1603_p13), %s1597_s6, 4096, %s1599_s8, %s1608_s10, %s1503_s5, %s1503_s5, %s1504_s7  }
  0x2e   : > { %p173_p0 = scmp.lt.s32.totalorder %s1500_s17, 5  ;;  %p1899_p2 = scmp.ge.s32.totalorder %s1500_s17, 1 }
  0x30   : > { %p174_p5 = pnand %p1899_p2, %p173_p0 }
  0x31   : > { %s1640_s11 = sand.u32 (!%p174_p5), 1, %s1484_s13  }
  0x32   : > { %177 = sbr.rel (%p174_p5) target bundleno = 407 (0x197), region = 32  ;;  %s942_s18 = sshll.u32 (!%p174_p5), %s1640_s11, 8 }
  0x33   : > { %s180_s19 = scalar_lea.sflag (!%p174_p5), [#allocation3], %s1640_s11  ;;  %s1646_s21 = scalar_lea.vmem (!%p174_p5), [#allocation2], %s942_s18 }
  0x39   : > { %1471 = dma.done.wait (%p1576_p8), %s180_s19, 4096  }
  0x3a   : > { %1473 = vsyncadd (%p1576_p8), %s180_s19, 4294963200  ;;  %v1505_v0 = vmov 0   ;;  %v240_v1 = vld [vmem:[%s1646_s21] sm:$0xff]  ;;  %v241_v2 = vld [vmem:[%s1646_s21 + $0x8] sm:$0xff]  ;;  %s1794_s10 = scalar_lea.vmem [#allocation5], %s942_s18  ;;  %s950_s18 = sshll.u32 %s1492_s15, 12 }
  0x3b   : > { %1259 = vset.pattern.permute.xlu1 %v1505_v0  ;;  %1258 = vset.pattern.permute.xlu0 %v1505_v0  ;;  %v577_v3 = vld [vmem:[%s1646_s21 + $0x80] sm:$0xff]  ;;  %v1127_v4 = vpack.c.bf16 %v241_v2, %v240_v1  ;;  %v578_v5 = vld [vmem:[%s1646_s21 + $0x88] sm:$0xff]  ;;  %v242_v6 = vld [vmem:[%s1646_s21 + $0x10] sm:$0xff]  ;;  %s849_s22 = sshll.u32 %s1794_s10, 4  ;;  %s1836_s29 = scalar_lea.hbm %s1892_s3, %s950_s18  ;;  %s1838_s22 = int_to_ptr.vmem [resolvable:$true] %s849_s22 }
  0x3c   : > { %v243_v7 = vld [vmem:[%s1646_s21 + $0x18] sm:$0xff]  ;;  %v1159_v8 = vpack.c.bf16 %v578_v5, %v577_v3  ;;  %v579_v10 = vld [vmem:[%s1646_s21 + $0x90] sm:$0xff]  ;;  %v244_v12 = vld [vmem:[%s1646_s21 + $0x20] sm:$0xff]  ;;  %s835_s15 = scalar_lea.sflag [#allocation4], %s1640_s11  ;;  %s1418_s30 = scalar_lea.vmem %s1838_s22, 4096 }
  0x3d   : > { %v1131_v9 = vpack.c.bf16 %v243_v7, %v242_v6  ;;  %v580_v11 = vld [vmem:[%s1646_s21 + $0x98] sm:$0xff]  ;;  %1128 = vmatprep.subr.bf16.mxu0 %v1127_v4  ;;  %v245_v14 = vld [vmem:[%s1646_s21 + $0x28] sm:$0xff]  ;;  %v581_v15 = vld [vmem:[%s1646_s21 + $0xa0] sm:$0xff]  ;;  %p1419_p8 = scmp.ne.s32.totalorder %s1838_s22, %s1418_s30  ;;  %p1900_p9 = scmp.ne.s32.totalorder %s1896_s25, 0 }
  0x3e   : > { %v1163_v13 = vpack.c.bf16 %v580_v11, %v579_v10  ;;  %v582_v16 = vld [vmem:[%s1646_s21 + $0xa8] sm:$0xff]  ;;  %1160 = vmatprep.subr.bf16.mxu1 %v1159_v8  ;;  %1130 = vmatpush3.bf16.msra.mxu0 %v1127_v4  ;;  %v1135_v17 = vpack.c.bf16 %v245_v14, %v244_v12  ;;  %v246_v19 = vld [vmem:[%s1646_s21 + $0x30] sm:$0xff]  ;;  %v247_v20 = vld [vmem:[%s1646_s21 + $0x38] sm:$0xff]  ;;  %s1506_s4 = smov [#allocation5]  }
  0x3f   : > { %1162 = vmatpush3.bf16.msra.mxu1 %v1159_v8  ;;  %1132 = vmatprep.subr.bf16.mxu0 %v1131_v9  ;;  %v1167_v18 = vpack.c.bf16 %v582_v16, %v581_v15  ;;  %v583_v21 = vld [vmem:[%s1646_s21 + $0xb0] sm:$0xff]  ;;  %v584_v22 = vld [vmem:[%s1646_s21 + $0xb8] sm:$0xff]  ;;  %v1139_v23 = vpack.c.bf16 %v247_v20, %v246_v19  ;;  %v248_v25 = vld [vmem:[%s1646_s21 + $0x40] sm:$0xff]  ;;  %p1420_p11 = pnand %p1419_p8, %p1900_p9  ;;  %s1422_s5 = sshll.u32 %s1506_s4, 4  ;;  %s1423_s5 = int_to_ptr.vmem [resolvable:$false] %s1422_s5 }
  0x40   : > { %1164 = vmatprep.subr.bf16.mxu1 %v1163_v13  ;;  %v1171_v24 = vpack.c.bf16 %v584_v22, %v583_v21  ;;  %v249_v26 = vld [vmem:[%s1646_s21 + $0x48] sm:$0xff]  ;;  %v208_v27 = vld [vmem:[%s1890_s1] sm:$0xff]  ;;  %v250_v32 = vld [vmem:[%s1646_s21 + $0x50] sm:$0xff]  ;;  %s1424_s7 = scalar_lea.vmem %s1423_s5, 8192  ;;  %p1425_p10 = scmp.lt.s32.totalorder %s1838_s22, %s1423_s5 }
  0x41   : > { %v585_v28 = vld [vmem:[%s1646_s21 + $0xc0] sm:$0xff]  ;;  %v586_v29 = vld [vmem:[%s1646_s21 + $0xc8] sm:$0xff]  ;;  %1047 = vmatprep.mubr.f32.mxu0 %v208_v27  ;;  %1103 = vmatprep.mubr.f32.mxu1 %v208_v27  ;;  %v1143_v30 = vpack.c.bf16 %v249_v26, %v248_v25  ;;  %v251_v33 = vld [vmem:[%s1646_s21 + $0x58] sm:$0xff]  ;;  %p1421_p13 = pneg %p1420_p11  ;;  %p1426_p12 = scmp.lt.s32.totalorder %s1424_s7, %s1418_s30 }
  0x42   : > { %1134 = vmatpush3.bf16.msra.mxu0 %v1131_v9  ;;  %v1175_v31 = vpack.c.bf16 %v586_v29, %v585_v28  ;;  %v587_v34 = vld [vmem:[%s1646_s21 + $0xd0] sm:$0xff]  ;;  %v588_v35 = vld [vmem:[%s1646_s21 + $0xd8] sm:$0xff]  ;;  %v224_v37 = vld [vmem:[%s1891_s2] sm:$0xff]  ;;  %v1147_v38 = vpack.c.bf16 %v251_v33, %v250_v32 }
  0x43   : > { %1166 = vmatpush3.bf16.msra.mxu1 %v1163_v13  ;;  %1136 = vmatprep.subr.bf16.mxu0 %v1135_v17  ;;  %v226_v36 = vld [vmem:[%s1891_s2 + $0x10] sm:$0xff]  ;;  %v1179_v39 = vpack.c.bf16 %v588_v35, %v587_v34  ;;  %v252_v40 = vld [vmem:[%s1646_s21 + $0x60] sm:$0xff]  ;;  %v253_v41 = vld [vmem:[%s1646_s21 + $0x68] sm:$0xff]  ;;  %p1427_p1 = por %p1426_p12, %p1425_p10 }
  0x44   : > { %1168 = vmatprep.subr.bf16.mxu1 %v1167_v18  ;;  %268 = vperm.xlu1 %1259, %v226_v36   ;;  %v589_v42 = vld [vmem:[%s1646_s21 + $0xe0] sm:$0xff]  ;;  %v590_v43 = vld [vmem:[%s1646_s21 + $0xe8] sm:$0xff]  ;;  %v227_v44 = vld [vmem:[%s1891_s2 + $0x18] sm:$0xff]  ;;  %v1151_v46 = vpack.c.bf16 %v253_v41, %v252_v40 }
  0x45   : > { %258 = vperm.xlu0 %1258, %v224_v37   ;;  %v225_v45 = vld [vmem:[%s1891_s2 + $0x8] sm:$0xff]  ;;  %v1183_v47 = vpack.c.bf16 %v590_v43, %v589_v42  ;;  %v254_v48 = vld [vmem:[%s1646_s21 + $0x70] sm:$0xff]  ;;  %v255_v49 = vld [vmem:[%s1646_s21 + $0x78] sm:$0xff]  ;;  %p1428_p3 = pnand %p1427_p1, %p1421_p13 }
  0x46   : > { %1138 = vmatpush3.bf16.msra.mxu0 %v1135_v17  ;;  %v591_v50 = vld [vmem:[%s1646_s21 + $0xf0] sm:$0xff]  ;;  %v592_v51 = vld [vmem:[%s1646_s21 + $0xf8] sm:$0xff]  ;;  %v229_v52 = vld [vmem:[%s1891_s2 + $0x28] sm:$0xff]  ;;  %v1155_v54 = vpack.c.bf16 %v255_v49, %v254_v48 }
  0x47   : > { %1170 = vmatpush3.bf16.msra.mxu1 %v1167_v18  ;;  %1140 = vmatprep.subr.bf16.mxu0 %v1139_v23  ;;  %v228_v53 = vld [vmem:[%s1891_s2 + $0x20] sm:$0xff]  ;;  %v1187_v55 = vpack.c.bf16 %v592_v51, %v591_v50  ;;  %v231_v56 = vld [vmem:[%s1891_s2 + $0x38] sm:$0xff]  ;;  %v230_v57 = vld [vmem:[%s1891_s2 + $0x30] sm:$0xff] }
  0x48   : > { %1172 = vmatprep.subr.bf16.mxu1 %v1171_v24  ;;  %273 = vperm.xlu1 %1259, %v227_v44   ;;  %v233_v58 = vld [vmem:[%s1891_s2 + $0x48] sm:$0xff]  ;;  %v232_v60 = vld [vmem:[%s1891_s2 + $0x40] sm:$0xff]  ;;  %v210_v61 = vld [vmem:[%s1890_s1 + $0x10] sm:$0xff] }
  0x49   : > { %263 = vperm.xlu0 %1258, %v225_v45   ;;  %v209_v59 = vld [vmem:[%s1890_s1 + $0x8] sm:$0xff]  ;;  %v235_v62 = vld [vmem:[%s1891_s2 + $0x58] sm:$0xff]  ;;  %v234_v0 = vld [vmem:[%s1891_s2 + $0x50] sm:$0xff] }
  0x4a   : > { %1142 = vmatpush3.bf16.msra.mxu0 %v1139_v23  ;;  %v211_v63 = vld [vmem:[%s1890_s1 + $0x18] sm:$0xff]  ;;  %v212_v1 = vld [vmem:[%s1890_s1 + $0x20] sm:$0xff]  ;;  %v237_v2 = vld [vmem:[%s1891_s2 + $0x68] sm:$0xff] }
  0x4b   : > { %1174 = vmatpush3.bf16.msra.mxu1 %v1171_v24  ;;  %1144 = vmatprep.subr.bf16.mxu0 %v1143_v30  ;;  %v213_v3 = vld [vmem:[%s1890_s1 + $0x28] sm:$0xff]  ;;  %v236_v4 = vld [vmem:[%s1891_s2 + $0x60] sm:$0xff]  ;;  %v214_v5 = vld [vmem:[%s1890_s1 + $0x30] sm:$0xff] }
  0x4c   : > { %1176 = vmatprep.subr.bf16.mxu1 %v1175_v31  ;;  %283 = vperm.xlu1 %1259, %v229_v52   ;;  %v239_v6 = vld [vmem:[%s1891_s2 + $0x78] sm:$0xff]  ;;  %v238_v8 = vld [vmem:[%s1891_s2 + $0x70] sm:$0xff]  ;;  %v216_v9 = vld [vmem:[%s1890_s1 + $0x40] sm:$0xff] }
  0x4d   : > { %278 = vperm.xlu0 %1258, %v228_v53   ;;  %v215_v7 = vld [vmem:[%s1890_s1 + $0x38] sm:$0xff]  ;;  %v217_v10 = vld [vmem:[%s1890_s1 + $0x48] sm:$0xff]  ;;  %v218_v11 = vld [vmem:[%s1890_s1 + $0x50] sm:$0xff] }
  0x4e   : > { %1146 = vmatpush3.bf16.msra.mxu0 %v1143_v30  ;;  %v219_v12 = vld [vmem:[%s1890_s1 + $0x58] sm:$0xff]  ;;  %v220_v13 = vld [vmem:[%s1890_s1 + $0x60] sm:$0xff]  ;;  %v221_v14 = vld [vmem:[%s1890_s1 + $0x68] sm:$0xff] }
  0x4f   : > { %1178 = vmatpush3.bf16.msra.mxu1 %v1175_v31  ;;  %1148 = vmatprep.subr.bf16.mxu0 %v1147_v38  ;;  %v222_v15 = vld [vmem:[%s1890_s1 + $0x70] sm:$0xff]  ;;  %v223_v16 = vld [vmem:[%s1890_s1 + $0x78] sm:$0xff] }
  0x50   : > { %1180 = vmatprep.subr.bf16.mxu1 %v1179_v39  ;;  %293 = vperm.xlu1 %1259, %v231_v56  }
  0x51   : > { %288 = vperm.xlu0 %1258, %v230_v57  }
  0x52   : > { %1150 = vmatpush3.bf16.msra.mxu0 %v1147_v38 }
  0x53   : > { %1182 = vmatpush3.bf16.msra.mxu1 %v1179_v39  ;;  %1152 = vmatprep.subr.bf16.mxu0 %v1151_v46 }
  0x54   : > { %1184 = vmatprep.subr.bf16.mxu1 %v1183_v47  ;;  %303 = vperm.xlu1 %1259, %v233_v58  }
  0x55   : > { %298 = vperm.xlu0 %1258, %v232_v60  }
  0x56   : > { %1154 = vmatpush3.bf16.msra.mxu0 %v1151_v46 }
  0x57   : > { %1186 = vmatpush3.bf16.msra.mxu1 %v1183_v47  ;;  %1156 = vmatprep.subr.bf16.mxu0 %v1155_v54 }
  0x58   : > { %1188 = vmatprep.subr.bf16.mxu1 %v1187_v55  ;;  %313 = vperm.xlu1 %1259, %v235_v62  }
  0x59   : > { %308 = vperm.xlu0 %1258, %v234_v0  }
  0x5a   : > { %1158 = vmatpush3.bf16.msra.mxu0 %v1155_v54 }
  0x5b   : > { %1190 = vmatpush3.bf16.msra.mxu1 %v1187_v55 }
  0x5c   : > { %323 = vperm.xlu1 %1259, %v237_v2  }
  0x5d   : > { %1048 = vmatmul.mubr.f32.vlgmr.msra.gmra.mrb[0].mxu0 %v209_v59  ;;  %318 = vperm.xlu0 %1258, %v236_v4  }
  0x5e   : > { %1104 = vmatmul.mubr.f32.vlgmr.msra.gmra.mrb[0].mxu1 %v209_v59  ;;  %1050 = vmatprep.mubr.f32.mxu0 %v210_v61 }
  0x5f   : > { %1106 = vmatprep.mubr.f32.mxu1 %v210_v61 }
  0x60   : > { %333 = vperm.xlu1 %1259, %v239_v6  }
  0x61   : > { %1051 = vmatmul.mubr.f32.gmra.mrb[2].mxu0 %v211_v63  ;;  %328 = vperm.xlu0 %1258, %v238_v8  }
  0x62   : > { %1107 = vmatmul.mubr.f32.gmra.mrb[2].mxu1 %v211_v63  ;;  %1053 = vmatprep.mubr.f32.mxu0 %v212_v1 }
  0x63   : > { %1109 = vmatprep.mubr.f32.mxu1 %v212_v1 }
  0x65   : > { %1054 = vmatmul.mubr.f32.gmra.mrb[4].mxu0 %v213_v3 }
  0x66   : > { %1110 = vmatmul.mubr.f32.gmra.mrb[4].mxu1 %v213_v3  ;;  %1056 = vmatprep.mubr.f32.mxu0 %v214_v5 }
  0x67   : > { %1112 = vmatprep.mubr.f32.mxu1 %v214_v5 }
  0x69   : > { %1057 = vmatmul.mubr.f32.gmra.mrb[6].mxu0 %v215_v7 }
  0x6a   : > { %1113 = vmatmul.mubr.f32.gmra.mrb[6].mxu1 %v215_v7  ;;  %1059 = vmatprep.mubr.f32.mxu0 %v216_v9 }
  0x6b   : > { %1115 = vmatprep.mubr.f32.mxu1 %v216_v9 }
  0x6d   : > { %1060 = vmatmul.mubr.f32.gmra.mrb[8].mxu0 %v217_v10 }
  0x6e   : > { %1116 = vmatmul.mubr.f32.gmra.mrb[8].mxu1 %v217_v10  ;;  %1062 = vmatprep.mubr.f32.mxu0 %v218_v11 }
  0x6f   : > { %1118 = vmatprep.mubr.f32.mxu1 %v218_v11 }
  0x71   : > { %1063 = vmatmul.mubr.f32.gmra.mrb[10].mxu0 %v219_v12 }
  0x72   : > { %1119 = vmatmul.mubr.f32.gmra.mrb[10].mxu1 %v219_v12  ;;  %1065 = vmatprep.mubr.f32.mxu0 %v220_v13 }
  0x73   : > { %1121 = vmatprep.mubr.f32.mxu1 %v220_v13 }
  0x75   : > { %1066 = vmatmul.mubr.f32.gmra.mrb[12].mxu0 %v221_v14 }
  0x76   : > { %1122 = vmatmul.mubr.f32.gmra.mrb[12].mxu1 %v221_v14  ;;  %1068 = vmatprep.mubr.f32.mxu0 %v222_v15 }
  0x77   : > { %1124 = vmatprep.mubr.f32.mxu1 %v222_v15 }
  0x79   : > { %1069 = vmatmul.mubr.f32.gmra.mrb[14].mxu0 %v223_v16 }
  0x7a   : > { %1125 = vmatmul.mubr.f32.gmra.mrb[14].mxu1 %v223_v16 }
  0xc3   : > { %v269_v17 = vpop.permute.xlu1 %268 }
  0xc4   : > { %v259_v18 = vpop.permute.xlu0 %258 }
  0xc7   : > { %v274_v19 = vpop.permute.xlu1 %273 }
  0xc8   : > { %v264_v20 = vpop.permute.xlu0 %263 }
  0xcb   : > { %v284_v38 = vpop.permute.xlu1 %283 }
  0xcc   : > { %v279_v55 = vpop.permute.xlu0 %278 }
  0xcf   : > { %v294_v63 = vpop.permute.xlu1 %293 }
  0xd0   : > { %v289_v13 = vpop.permute.xlu0 %288 }
 0x130   : > { %v1049_v21 = vpop.f32.mrb[0].mxu0 }
 0x131   : > { %v408_v22 = vadd.f32 %v1049_v21, %v264_v20  ;;  %v1105_v23 = vpop.f32.mrb[0].mxu1  ;;  %v402_v24 = vpop.f32.mrb[1].mxu0 }
 0x132   : > { %v665_v25 = vadd.f32 %v1105_v23, %v264_v20  ;;  %v403_v26 = vadd.f32 %v402_v24, %v259_v18  ;;  %v659_v27 = vpop.f32.mrb[1].mxu1 }
 0x133   : > { %v482_v28 = vsub.f32 0.0, %v408_v22  ;;  %v660_v29 = vadd.f32 %v659_v27, %v259_v18  ;;  %v304_v22 = vpop.permute.xlu1 %303 }
 0x134   : > { %v739_v30 = vsub.f32 0.0, %v665_v25  ;;  %v481_v31 = vsub.f32 0.0, %v403_v26  ;;  %v1052_v32 = vpop.f32.mrb[2].mxu0 }
 0x135   : > { %v499_v33 = vmul.f32 1.442695, %v482_v28  ;;  %v738_v34 = vsub.f32 0.0, %v660_v29  ;;  %v418_v35 = vadd.f32 %v1052_v32, %v274_v19  ;;  %v1108_v36 = vpop.f32.mrb[2].mxu1  ;;  %v412_v37 = vpop.f32.mrb[3].mxu0 }
 0x136   : > { %v756_v39 = vmul.f32 1.442695, %v739_v30  ;;  %v497_v40 = vmul.f32 1.442695, %v481_v31  ;;  %v675_v41 = vadd.f32 %v1108_v36, %v274_v19  ;;  %v413_v42 = vadd.f32 %v412_v37, %v269_v17  ;;  %v669_v43 = vpop.f32.mrb[3].mxu1  ;;  %v299_v37 = vpop.permute.xlu0 %298 }
 0x137   : > { %1260 = vpow2.f32 %v499_v33  ;;  %v754_v44 = vmul.f32 1.442695, %v738_v34  ;;  %v484_v45 = vsub.f32 0.0, %v418_v35  ;;  %v670_v46 = vadd.f32 %v669_v43, %v269_v17 }
 0x138   : > { %1262 = vpow2.f32 %v756_v39  ;;  %v741_v47 = vsub.f32 0.0, %v675_v41  ;;  %v483_v48 = vsub.f32 0.0, %v413_v42  ;;  %v1055_v49 = vpop.f32.mrb[4].mxu0 }
 0x139   : > { %1264 = vpow2.f32 %v497_v40  ;;  %v503_v50 = vmul.f32 1.442695, %v484_v45  ;;  %v740_v51 = vsub.f32 0.0, %v670_v46  ;;  %v428_v52 = vadd.f32 %v1055_v49, %v284_v38  ;;  %v1111_v53 = vpop.f32.mrb[4].mxu1  ;;  %v422_v54 = vpop.f32.mrb[5].mxu0 }
 0x13a   : > { %1266 = vpow2.f32 %v754_v44  ;;  %v760_v56 = vmul.f32 1.442695, %v741_v47  ;;  %v501_v57 = vmul.f32 1.442695, %v483_v48  ;;  %v685_v58 = vadd.f32 %v1111_v53, %v284_v38  ;;  %v679_v59 = vpop.f32.mrb[5].mxu1  ;;  %v314_v45 = vpop.permute.xlu1 %313 }
 0x13b   : > { %1268 = vpow2.f32 %v503_v50  ;;  %v758_v60 = vmul.f32 1.442695, %v740_v51  ;;  %v486_v61 = vsub.f32 0.0, %v428_v52  ;;  %v423_v62 = vadd.f32 %v422_v54, %v279_v55 }
 0x13c   : > { %1270 = vpow2.f32 %v760_v56  ;;  %v743_v0 = vsub.f32 0.0, %v685_v58  ;;  %v680_v1 = vadd.f32 %v679_v59, %v279_v55  ;;  %v1058_v2 = vpop.f32.mrb[6].mxu0 }
 0x13d   : > { %1272 = vpow2.f32 %v501_v57  ;;  %v507_v3 = vmul.f32 1.442695, %v486_v61  ;;  %v485_v4 = vsub.f32 0.0, %v423_v62  ;;  %v438_v5 = vadd.f32 %v1058_v2, %v294_v63  ;;  %v1114_v6 = vpop.f32.mrb[6].mxu1  ;;  %v432_v7 = vpop.f32.mrb[7].mxu0 }
 0x13e   : > { %1274 = vpow2.f32 %v758_v60  ;;  %v764_v8 = vmul.f32 1.442695, %v743_v0  ;;  %v742_v9 = vsub.f32 0.0, %v680_v1  ;;  %v689_v10 = vpop.f32.mrb[7].mxu1  ;;  %v695_v18 = vadd.f32 %v1114_v6, %v294_v63  ;;  %v309_v1 = vpop.permute.xlu0 %308 }
 0x13f   : > { %1276 = vpow2.f32 %v507_v3  ;;  %v505_v11 = vmul.f32 1.442695, %v485_v4  ;;  %v488_v12 = vsub.f32 0.0, %v438_v5  ;;  %v433_v27 = vadd.f32 %v432_v7, %v289_v13 }
 0x140   : > { %1278 = vpow2.f32 %v764_v8  ;;  %v762_v14 = vmul.f32 1.442695, %v742_v9  ;;  %v1061_v15 = vpop.f32.mrb[8].mxu0  ;;  %v745_v33 = vsub.f32 0.0, %v695_v18  ;;  %v690_v39 = vadd.f32 %v689_v10, %v289_v13  ;;  %v324_v18 = vpop.permute.xlu1 %323 }
 0x141   : > { %v1261_v16 = vpop.eup %1260  ;;  %1280 = vpow2.f32 %v505_v11  ;;  %v511_v17 = vmul.f32 1.442695, %v488_v12  ;;  %v1117_v19 = vpop.f32.mrb[8].mxu1  ;;  %v487_v43 = vsub.f32 0.0, %v433_v27  ;;  %v448_v47 = vadd.f32 %v1061_v15, %v304_v22 }
 0x142   : > { %v442_v20 = vpop.f32.mrb[9].mxu0  ;;  %v1263_v21 = vpop.eup %1262  ;;  %v530_v23 = vadd.f32 1.0, %v1261_v16  ;;  %1282 = vpow2.f32 %v762_v14  ;;  %v768_v51 = vmul.f32 1.442695, %v745_v33  ;;  %v705_v52 = vadd.f32 %v1117_v19, %v304_v22 }
 0x143   : > { %v699_v24 = vpop.f32.mrb[9].mxu1  ;;  %v1265_v25 = vpop.eup %1264  ;;  %v787_v26 = vadd.f32 1.0, %v1263_v21  ;;  %1284 = vpow2.f32 %v511_v17  ;;  %v744_v57 = vsub.f32 0.0, %v690_v39  ;;  %v443_v58 = vadd.f32 %v442_v20, %v299_v37 }
 0x144   : > { %v1267_v28 = vpop.eup %1266  ;;  %1286 = vrcp.f32 %v530_v23  ;;  %v529_v29 = vadd.f32 1.0, %v1265_v25  ;;  %v1064_v30 = vpop.f32.mrb[10].mxu0  ;;  %v509_v62 = vmul.f32 1.442695, %v487_v43  ;;  %v700_v63 = vadd.f32 %v699_v24, %v299_v37 }
 0x145   : > { %v1269_v31 = vpop.eup %1268  ;;  %1288 = vrcp.f32 %v787_v26  ;;  %v786_v32 = vadd.f32 1.0, %v1267_v28  ;;  %v1120_v34 = vpop.f32.mrb[10].mxu1  ;;  %v490_v3 = vsub.f32 0.0, %v448_v47  ;;  %v458_v4 = vadd.f32 %v1064_v30, %v314_v45 }
 0x146   : > { %v452_v35 = vpop.f32.mrb[11].mxu0  ;;  %v1271_v36 = vpop.eup %1270  ;;  %1290 = vrcp.f32 %v529_v29  ;;  %v532_v38 = vadd.f32 1.0, %v1269_v31  ;;  %v747_v8 = vsub.f32 0.0, %v705_v52  ;;  %v715_v9 = vadd.f32 %v1120_v34, %v314_v45 }
 0x147   : > { %v709_v40 = vpop.f32.mrb[11].mxu1  ;;  %v1273_v41 = vpop.eup %1272  ;;  %1292 = vrcp.f32 %v786_v32  ;;  %v789_v42 = vadd.f32 1.0, %v1271_v36  ;;  %v489_v14 = vsub.f32 0.0, %v443_v58  ;;  %v453_v15 = vadd.f32 %v452_v35, %v309_v1 }
 0x148   : > { %v1275_v44 = vpop.eup %1274  ;;  %1294 = vrcp.f32 %v532_v38  ;;  %v531_v46 = vadd.f32 1.0, %v1273_v41  ;;  %v1067_v48 = vpop.f32.mrb[12].mxu0  ;;  %v766_v19 = vmul.f32 1.442695, %v744_v57  ;;  %v746_v20 = vsub.f32 0.0, %v700_v63 }
 0x149   : > { %v1277_v49 = vpop.eup %1276  ;;  %1296 = vrcp.f32 %v789_v42  ;;  %v788_v50 = vadd.f32 1.0, %v1275_v44  ;;  %v1123_v53 = vpop.f32.mrb[12].mxu1  ;;  %v710_v21 = vadd.f32 %v709_v40, %v309_v1  ;;  %v515_v23 = vmul.f32 1.442695, %v490_v3 }
 0x14a   : > { %v1780_v54 = vpop.f32.mrb[13].mxu0  ;;  %v1279_v55 = vpop.eup %1278  ;;  %1298 = vrcp.f32 %v531_v46  ;;  %v534_v56 = vadd.f32 1.0, %v1277_v49  ;;  %v492_v24 = vsub.f32 0.0, %v458_v4  ;;  %v468_v25 = vadd.f32 %v1067_v48, %v324_v18 }
 0x14b   : > { %v1782_v59 = vpop.f32.mrb[13].mxu1  ;;  %v1281_v60 = vpop.eup %1280  ;;  %1300 = vrcp.f32 %v788_v50  ;;  %v791_v61 = vadd.f32 1.0, %v1279_v55  ;;  %v772_v27 = vmul.f32 1.442695, %v747_v8  ;;  %v749_v28 = vsub.f32 0.0, %v715_v9 }
 0x14c   : > { %v1283_v0 = vpop.eup %1282  ;;  %1302 = vrcp.f32 %v534_v56  ;;  %v533_v2 = vadd.f32 1.0, %v1281_v60  ;;  %v1784_v5 = vpop.f32.mrb[14].mxu0  ;;  %v725_v29 = vadd.f32 %v1123_v53, %v324_v18  ;;  %v513_v31 = vmul.f32 1.442695, %v489_v14 }
 0x14d   : > { %v1285_v6 = vpop.eup %1284  ;;  %1304 = vrcp.f32 %v791_v61  ;;  %v790_v7 = vadd.f32 1.0, %v1283_v0  ;;  %v1786_v10 = vpop.f32.mrb[14].mxu1  ;;  %v491_v32 = vsub.f32 0.0, %v453_v15  ;;  %v770_v34 = vmul.f32 1.442695, %v746_v20 }
 0x14e   : > { %v1788_v11 = vpop.f32.mrb[15].mxu0  ;;  %v1287_v12 = vpop.eup %1286  ;;  %1306 = vrcp.f32 %v533_v2  ;;  %v536_v13 = vadd.f32 1.0, %v1285_v6  ;;  %v748_v35 = vsub.f32 0.0, %v710_v21  ;;  %v519_v37 = vmul.f32 1.442695, %v492_v24 }
 0x14f   : > { %v1790_v16 = vpop.f32.mrb[15].mxu1  ;;  %v1289_v17 = vpop.eup %1288  ;;  %562 = vst [vmem:[%s1794_s10 + $0x8] sm:$0xff] %v1287_v12  ;;  %1308 = vrcp.f32 %v790_v7  ;;  %v494_v38 = vsub.f32 0.0, %v468_v25  ;;  %v776_v40 = vmul.f32 1.442695, %v749_v28  ;;  %v751_v41 = vsub.f32 0.0, %v725_v29 }
 0x150   : > { %v1291_v22 = vpop.eup %1290  ;;  %819 = vst [vmem:[%s1794_s10 + $0x88] sm:$0xff] %v1289_v17  ;;  %1310 = vrcp.f32 %v536_v13  ;;  %v517_v43 = vmul.f32 1.442695, %v491_v32  ;;  %v774_v45 = vmul.f32 1.442695, %v748_v35  ;;  %v319_v53 = vpop.permute.xlu0 %318 }
 0x151   : > { %v1293_v26 = vpop.eup %1292  ;;  %561 = vst [vmem:[%s1794_s10] sm:$0xff] %v1291_v22  ;;  %1312 = vpow2.f32 %v768_v51  ;;  %v523_v47 = vmul.f32 1.442695, %v494_v38  ;;  %v780_v49 = vmul.f32 1.442695, %v751_v41  ;;  %v463_v63 = vadd.f32 %v1780_v54, %v319_v53  ;;  %v334_v1 = vpop.permute.xlu1 %333 }
 0x152   : > { %v1295_v30 = vpop.eup %1294  ;;  %818 = vst [vmem:[%s1794_s10 + $0x80] sm:$0xff] %v1293_v26  ;;  %1314 = vpow2.f32 %v509_v62  ;;  %v720_v3 = vadd.f32 %v1782_v59, %v319_v53  ;;  %v478_v7 = vadd.f32 %v1784_v5, %v334_v1  ;;  %v735_v13 = vadd.f32 %v1786_v10, %v334_v1 }
 0x153   : > { %v1297_v33 = vpop.eup %1296  ;;  %564 = vst [vmem:[%s1794_s10 + $0x18] sm:$0xff] %v1295_v30  ;;  %1316 = vpow2.f32 %v766_v19  ;;  %v493_v15 = vsub.f32 0.0, %v463_v63 }
 0x154   : > { %v1299_v36 = vpop.eup %1298  ;;  %821 = vst [vmem:[%s1794_s10 + $0x98] sm:$0xff] %v1297_v33  ;;  %1318 = vpow2.f32 %v515_v23  ;;  %v329_v9 = vpop.permute.xlu0 %328  ;;  %v750_v19 = vsub.f32 0.0, %v720_v3  ;;  %v496_v22 = vsub.f32 0.0, %v478_v7  ;;  %v753_v24 = vsub.f32 0.0, %v735_v13 }
 0x155   : > { %v1301_v39 = vpop.eup %1300  ;;  %563 = vst [vmem:[%s1794_s10 + $0x10] sm:$0xff] %v1299_v36  ;;  %1320 = vpow2.f32 %v772_v27  ;;  %v473_v17 = vadd.f32 %v1788_v11, %v329_v9  ;;  %v730_v20 = vadd.f32 %v1790_v16, %v329_v9  ;;  %v521_v11 = vmul.f32 1.442695, %v493_v15 }
 0x156   : > { %v1303_v42 = vpop.eup %1302  ;;  %820 = vst [vmem:[%s1794_s10 + $0x90] sm:$0xff] %v1301_v39  ;;  %1322 = vpow2.f32 %v513_v31  ;;  %v778_v16 = vmul.f32 1.442695, %v750_v19  ;;  %v527_v32 = vmul.f32 1.442695, %v496_v22 }
 0x157   : > { %v1305_v44 = vpop.eup %1304  ;;  %566 = vst [vmem:[%s1794_s10 + $0x28] sm:$0xff] %v1303_v42  ;;  %1324 = vpow2.f32 %v770_v34  ;;  %v495_v27 = vsub.f32 0.0, %v473_v17  ;;  %v752_v30 = vsub.f32 0.0, %v730_v20  ;;  %v784_v34 = vmul.f32 1.442695, %v753_v24 }
 0x158   : > { %v1307_v46 = vpop.eup %1306  ;;  %823 = vst [vmem:[%s1794_s10 + $0xa8] sm:$0xff] %v1305_v44  ;;  %1326 = vpow2.f32 %v519_v37 }
 0x159   : > { %v1309_v48 = vpop.eup %1308  ;;  %565 = vst [vmem:[%s1794_s10 + $0x20] sm:$0xff] %v1307_v46  ;;  %1328 = vpow2.f32 %v776_v40  ;;  %v525_v36 = vmul.f32 1.442695, %v495_v27  ;;  %v782_v38 = vmul.f32 1.442695, %v752_v30 }
 0x15a   : > { %v1311_v50 = vpop.eup %1310  ;;  %822 = vst [vmem:[%s1794_s10 + $0xa0] sm:$0xff] %v1309_v48  ;;  %1330 = vpow2.f32 %v517_v43 }
 0x15b   : > { %v1313_v51 = vpop.eup %1312  ;;  %568 = vst [vmem:[%s1794_s10 + $0x38] sm:$0xff] %v1311_v50  ;;  %1332 = vpow2.f32 %v774_v45 }
 0x15c   : > { %v1315_v52 = vpop.eup %1314  ;;  %v793_v55 = vadd.f32 1.0, %v1313_v51  ;;  %1334 = vpow2.f32 %v523_v47 }
 0x15d   : > { %v1317_v56 = vpop.eup %1316  ;;  %v535_v57 = vadd.f32 1.0, %v1315_v52  ;;  %1336 = vpow2.f32 %v780_v49 }
 0x15e   : > { %v1319_v58 = vpop.eup %1318  ;;  %1338 = vrcp.f32 %v793_v55  ;;  %v792_v60 = vadd.f32 1.0, %v1317_v56 }
 0x15f   : > { %v1321_v61 = vpop.eup %1320  ;;  %1340 = vrcp.f32 %v535_v57  ;;  %v538_v62 = vadd.f32 1.0, %v1319_v58 }
 0x160   : > { %v1323_v0 = vpop.eup %1322  ;;  %1342 = vrcp.f32 %v792_v60  ;;  %v795_v2 = vadd.f32 1.0, %v1321_v61 }
 0x161   : > { %v1325_v4 = vpop.eup %1324  ;;  %1344 = vrcp.f32 %v538_v62  ;;  %v537_v6 = vadd.f32 1.0, %v1323_v0 }
 0x162   : > { %v1327_v8 = vpop.eup %1326  ;;  %1346 = vrcp.f32 %v795_v2  ;;  %v794_v12 = vadd.f32 1.0, %v1325_v4 }
 0x163   : > { %v1329_v14 = vpop.eup %1328  ;;  %1348 = vrcp.f32 %v537_v6  ;;  %v540_v54 = vadd.f32 1.0, %v1327_v8 }
 0x164   : > { %v1331_v18 = vpop.eup %1330  ;;  %1350 = vrcp.f32 %v794_v12  ;;  %v797_v59 = vadd.f32 1.0, %v1329_v14 }
 0x165   : > { %v1333_v21 = vpop.eup %1332  ;;  %1352 = vrcp.f32 %v540_v54  ;;  %v539_v5 = vadd.f32 1.0, %v1331_v18 }
 0x166   : > { %v1335_v23 = vpop.eup %1334  ;;  %1354 = vrcp.f32 %v797_v59  ;;  %v796_v10 = vadd.f32 1.0, %v1333_v21 }
 0x167   : > { %v1337_v25 = vpop.eup %1336  ;;  %1356 = vrcp.f32 %v539_v5  ;;  %v542_v26 = vadd.f32 1.0, %v1335_v23 }
 0x168   : > { %v1339_v28 = vpop.eup %1338  ;;  %1358 = vrcp.f32 %v796_v10  ;;  %v799_v29 = vadd.f32 1.0, %v1337_v25 }
 0x169   : > { %v1341_v31 = vpop.eup %1340  ;;  %825 = vst [vmem:[%s1794_s10 + $0xb8] sm:$0xff] %v1339_v28  ;;  %1360 = vrcp.f32 %v542_v26 }
 0x16a   : > { %v1343_v33 = vpop.eup %1342  ;;  %567 = vst [vmem:[%s1794_s10 + $0x30] sm:$0xff] %v1341_v31  ;;  %1362 = vrcp.f32 %v799_v29 }
 0x16b   : > { %v1345_v35 = vpop.eup %1344  ;;  %824 = vst [vmem:[%s1794_s10 + $0xb0] sm:$0xff] %v1343_v33  ;;  %1364 = vpow2.f32 %v521_v11 }
 0x16c   : > { %v1347_v37 = vpop.eup %1346  ;;  %570 = vst [vmem:[%s1794_s10 + $0x48] sm:$0xff] %v1345_v35  ;;  %1366 = vpow2.f32 %v778_v16 }
 0x16d   : > { %v1349_v39 = vpop.eup %1348  ;;  %827 = vst [vmem:[%s1794_s10 + $0xc8] sm:$0xff] %v1347_v37  ;;  %1368 = vpow2.f32 %v527_v32 }
 0x16e   : > { %v1351_v40 = vpop.eup %1350  ;;  %569 = vst [vmem:[%s1794_s10 + $0x40] sm:$0xff] %v1349_v39  ;;  %1370 = vpow2.f32 %v784_v34 }
 0x16f   : > { %v1353_v41 = vpop.eup %1352  ;;  %826 = vst [vmem:[%s1794_s10 + $0xc0] sm:$0xff] %v1351_v40  ;;  %1372 = vpow2.f32 %v525_v36 }
 0x170   : > { %v1355_v42 = vpop.eup %1354  ;;  %572 = vst [vmem:[%s1794_s10 + $0x58] sm:$0xff] %v1353_v41  ;;  %1374 = vpow2.f32 %v782_v38 }
 0x171   : > { %v1357_v43 = vpop.eup %1356  ;;  %829 = vst [vmem:[%s1794_s10 + $0xd8] sm:$0xff] %v1355_v42 }
 0x172   : > { %v1359_v44 = vpop.eup %1358  ;;  %571 = vst [vmem:[%s1794_s10 + $0x50] sm:$0xff] %v1357_v43 }
 0x173   : > { %v1361_v45 = vpop.eup %1360  ;;  %828 = vst [vmem:[%s1794_s10 + $0xd0] sm:$0xff] %v1359_v44 }
 0x174   : > { %v1363_v46 = vpop.eup %1362  ;;  %574 = vst [vmem:[%s1794_s10 + $0x68] sm:$0xff] %v1361_v45 }
 0x175   : > { %v1365_v47 = vpop.eup %1364  ;;  %831 = vst [vmem:[%s1794_s10 + $0xe8] sm:$0xff] %v1363_v46 }
 0x176   : > { %v1367_v48 = vpop.eup %1366  ;;  %v541_v49 = vadd.f32 1.0, %v1365_v47 }
 0x177   : > { %v1369_v50 = vpop.eup %1368  ;;  %v798_v51 = vadd.f32 1.0, %v1367_v48 }
 0x178   : > { %v1371_v52 = vpop.eup %1370  ;;  %1376 = vrcp.f32 %v541_v49  ;;  %v544_v53 = vadd.f32 1.0, %v1369_v50 }
 0x179   : > { %v1373_v55 = vpop.eup %1372  ;;  %1378 = vrcp.f32 %v798_v51  ;;  %v801_v56 = vadd.f32 1.0, %v1371_v52 }
 0x17a   : > { %v1375_v57 = vpop.eup %1374  ;;  %1380 = vrcp.f32 %v544_v53  ;;  %v543_v58 = vadd.f32 1.0, %v1373_v55 }
 0x17b   : > { %1382 = vrcp.f32 %v801_v56  ;;  %v800_v60 = vadd.f32 1.0, %v1375_v57 }
 0x17c   : > { %1384 = vrcp.f32 %v543_v58 }
 0x17d   : > { %1386 = vrcp.f32 %v800_v60 }
 0x182   : > { %v1377_v61 = vpop.eup %1376 }
 0x183   : > { %v1379_v62 = vpop.eup %1378  ;;  %573 = vst [vmem:[%s1794_s10 + $0x60] sm:$0xff] %v1377_v61 }
 0x184   : > { %v1381_v63 = vpop.eup %1380  ;;  %830 = vst [vmem:[%s1794_s10 + $0xe0] sm:$0xff] %v1379_v62 }
 0x185   : > { %v1383_v0 = vpop.eup %1382  ;;  %576 = vst [vmem:[%s1794_s10 + $0x78] sm:$0xff] %v1381_v63 }
 0x186   : > { %v1385_v1 = vpop.eup %1384  ;;  %833 = vst [vmem:[%s1794_s10 + $0xf8] sm:$0xff] %v1383_v0 }
 0x187   : > { %v1387_v2 = vpop.eup %1386  ;;  %575 = vst [vmem:[%s1794_s10 + $0x70] sm:$0xff] %v1385_v1 }
 0x188   : > { %832 = vst [vmem:[%s1794_s10 + $0xf0] sm:$0xff] %v1387_v2 }
 0x189   : > { %1431 = shalt.err (!%p1428_p3)
}
 0x18a   : > { %s1432_s19 = scalar_lea.hbm %s1836_s29, 4096  ;;  %s1436_s21 = scalar_lea.hbm %s1892_s3, 16384 }
 0x18b   : > { %p1433_p4 = scmp.ne.s32.totalorder %s1836_s29, %s1432_s19  ;;  %p1437_p0 = scmp.lt.u32.totalorder %s1836_s29, %s1892_s3 }
 0x18c   : > { %p1438_p2 = scmp.lt.u32.totalorder %s1436_s21, %s1432_s19  ;;  %p1440_p8 = scmp.lt.u32.totalorder %s1432_s19, %s1836_s29 }
 0x18d   : > { %p1434_p6 = pnand %p1433_p4, %p1900_p9 }
 0x18e   : > { %p1439_p5 = por %p1438_p2, %p1437_p0 }
 0x18f   : > { %p1435_p7 = pneg %p1434_p6 }
 0x190   : > { %p1441_p11 = por %p1440_p8, %p1439_p5 }
 0x192   : > { %p1442_p13 = pnand %p1441_p11, %p1435_p7 }
 0x194   : > { %1445 = shalt.err (!%p1442_p13)
}
 0x195   : > { %s1507_s10 = smov 128   ;;  %s1508_s18 = smov 8  }
 0x196   : > { %1193 = dma.vmem_to_hbm [thread:$0]  (%p1900_p9), %s1838_s22, 4096, %s1836_s29, %s835_s15, %s1507_s10, %s1507_s10, %s1508_s18  }
 0x197 PF: > { %p1204_p10 = scmp.ge.s32.totalorder %s1500_s17, 2  ;;  %s864_s23 = sand.u32 1, %s1480_s12  }
 0x198   : > { %p1901_p12 = scmp.ne.s32.totalorder %s1897_s27, 0  ;;  %s865_s28 = scalar_lea.sflag [#allocation4], %s864_s23 }
 0x19a   : > { %p1200_p1 = pnand %p1204_p10, %p1901_p12 }
 0x19c   : > { %1475 = dma.done.wait (!%p1200_p1), %s865_s28, 4096  }
 0x19d   : > { %1477 = vsyncadd (!%p1200_p1), %s865_s28, 4294963200  ;;  %s19_s17 = sadd.s32 1, %s1500_s17   ;;  %s1902_s12 = smov %s1484_s13 }
 0x19e   : > { %p16_p3 = scmp.ge.s32.totalorder %s19_s17, 6   ;;  %s1903_s13 = smov %s1488_s14 }
 0x19f   : > { %s1904_s14 = smov %s1585_s26  ;;  %s1905_s15 = smov %s1496_s16 }
 0x1a0   : > { %s1906_s16 = smov %s1908_s20  ;;  %18 = sbr.rel (!%p16_p3) target bundleno = 6 (0x6), region = 77 }
 0x1a7   :  { %870 = vsyncpa [#allocation3], 1 }
 0x1a8   :  { %872 = vsyncpa [#allocation3 + $0x1], 1 }
 0x1a9   :  { %873 = vsyncpa [#allocation4], 1 }
 0x1aa   :  { %875 = vsyncpa [#allocation4 + $0x1], 1 }

</bundles_post_ra>
